<compile_context>
chip_gen: v7x
topology: tpu7x:2x2x1
jax: 0.10.0
libtpu: 0.0.40
codegen_flags: <defaults>
</compile_context>

<pallas_src>
import math
import functools

import jax
import jax.numpy as jnp
from jax import lax
from jax.experimental import pallas as pl
from jax.experimental.pallas import tpu as pltpu


def _mha_kernel(x_ref, wqkv_ref, bqkv_ref, mbias_ref, o_ref, *,
                num_heads, head_dim):
    # x_ref:     (1, T, H)       current batch row
    # wqkv_ref:  (H, 3*nh*hd)    fused Q|K|V projection weights (VMEM-resident)
    # bqkv_ref:  (1, 3*nh*hd)    fused biases
    # mbias_ref: (1, 1, T)       precomputed additive mask bias (0 or -1e4)
    # o_ref:     (1, T, nh*hd)   final output layout (lane-dense, 128 wide)
    D = num_heads * head_dim
    x = x_ref[0]                                               # (T, H)

    # One fused projection matmul for Q, K, V of all heads.
    qkv = jnp.dot(x, wqkv_ref[...],
                  preferred_element_type=jnp.float32) + bqkv_ref[...]  # (T, 3D)
    q = qkv[:, 0:D]
    k = qkv[:, D:2 * D]
    v = qkv[:, 2 * D:3 * D]

    scale = 1.0 / math.sqrt(head_dim)
    mbias = mbias_ref[0]                                       # (1, T), broadcasts over queries

    # Static loop over heads (nh is small); per-head attention in f32.
    outs = []
    for h in range(num_heads):
        sl = slice(h * head_dim, (h + 1) * head_dim)
        qh = q[:, sl]
        kh = k[:, sl]
        vh = v[:, sl]

        # Contract on the last (feature) dims; no explicit transpose of kh.
        s = lax.dot_general(qh, kh, (((1,), (1,)), ((), ())),
                            preferred_element_type=jnp.float32) * scale  # (T, T)
        s = s + mbias

        # Numerically stable softmax; exact divide (approx reciprocal was the
        # source of the 2.5e-3 mismatch against the f32 reference).
        s_max = jnp.max(s, axis=-1, keepdims=True)
        e = jnp.exp(s - s_max)
        denom = jnp.sum(e, axis=-1, keepdims=True)
        p = e / denom

        # TODO(synk): nn.Dropout on attention probs is identity in eval mode; not applied.
        outs.append(jnp.dot(p, vh, preferred_element_type=jnp.float32))   # (T, hd)

    y = jnp.concatenate(outs, axis=-1)                          # (T, nh*hd)
    o_ref[0] = y.astype(o_ref.dtype)


def multihead_attention(hidden_states, wq, wk, wv, bq, bk, bv, attention_mask):
    """Pallas implementation of MultiheadAttention.forward.

    hidden_states: (B, T, H) float32
    wq/wk/wv:      (nh, H, hd)  per-head (in, out) projection weights
    bq/bk/bv:      (nh, 1, hd)  per-head biases
    attention_mask:(B, T)       1.0 = attend, 0.0 = masked (as in the module)
    returns:       (B, T, nh*hd)   (same layout as the PyTorch module)
    """
    B, T, H = hidden_states.shape
    nh, _, hd = wq.shape
    D = nh * hd

    # Fuse Q|K|V and all heads into one (H, 3D) weight + (1, 3D) bias.
    # Column order within each projection matches PyTorch's head split
    # (head h -> columns h*hd:(h+1)*hd).
    w_qkv = jnp.concatenate([
        wq.transpose(1, 0, 2).reshape(H, D),
        wk.transpose(1, 0, 2).reshape(H, D),
        wv.transpose(1, 0, 2).reshape(H, D),
    ], axis=-1)                                                 # (H, 3D)
    b_qkv = jnp.concatenate([
        bq.reshape(D), bk.reshape(D), bv.reshape(D)
    ]).reshape(1, 3 * D)                                        # (1, 3D)

    # Precompute the additive mask bias once: (1 - mask) * -10000.
    mask_bias = ((1.0 - attention_mask) * (-10000.0)).reshape(B, 1, T)

    kernel = functools.partial(_mha_kernel, num_heads=nh, head_dim=hd)

    out = pl.pallas_call(
        kernel,
        out_shape=jax.ShapeDtypeStruct((B, T, D), hidden_states.dtype),
        grid_spec=pltpu.PrefetchScalarGridSpec(
            num_scalar_prefetch=0,
            grid=(B,),
            in_specs=[
                pl.BlockSpec((1, T, H), lambda b: (b, 0, 0)),     # x (per batch)
                pl.BlockSpec((H, 3 * D), lambda b: (0, 0)),       # fused W (resident)
                pl.BlockSpec((1, 3 * D), lambda b: (0, 0)),       # fused bias (resident)
                pl.BlockSpec((1, 1, T), lambda b: (b, 0, 0)),     # mask bias (per batch)
            ],
            out_specs=pl.BlockSpec((1, T, D), lambda b: (b, 0, 0)),
        ),
        compiler_params=pltpu.CompilerParams(
            dimension_semantics=("parallel",)),
    )(hidden_states, w_qkv, b_qkv, mask_bias)
    return out


def _reference(hidden_states, wq, wk, wv, bq, bk, bv, attention_mask):
    """Pure-JAX reference mirroring the PyTorch forward."""
    B, T, H = hidden_states.shape
    nh, _, hd = wq.shape
    q = jnp.einsum('bth,nhd->bntd', hidden_states, wq) + bq[None]   # (B, nh, T, hd)
    k = jnp.einsum('bth,nhd->bntd', hidden_states, wk) + bk[None]
    v = jnp.einsum('bth,nhd->bntd', hidden_states, wv) + bv[None]
    scores = jnp.einsum('bntd,bnsd->bnts', q, k) / math.sqrt(hd)
    mask = attention_mask[:, None, None, :]                         # (B,1,1,T)
    scores = scores + (1.0 - mask) * (-10000.0)
    probs = jax.nn.softmax(scores, axis=-1)
    y = jnp.einsum('bnts,bnsd->bntd', probs, v)
    return y.transpose(0, 2, 1, 3).reshape(B, T, nh * hd)


if __name__ == "__main__":
    # config: num_embed_hidden=32, num_attention_heads=4
    # => num_attn_proj = 128, attention_head_size = 32
    B, T, H, nh = 2, 8, 32, 4
    hd = H  # attention_head_size == num_embed_hidden for this config

    key = jax.random.PRNGKey(0)
    ks = jax.random.split(key, 8)
    hidden_states = jax.random.normal(ks[0], (B, T, H), dtype=jnp.float32)

    # deterministic parameter init (synthetic, not a checkpoint load)
    scale = 1.0 / math.sqrt(H)
    wq = jax.random.uniform(ks[1], (nh, H, hd), jnp.float32, -scale, scale)
    wk = jax.random.uniform(ks[2], (nh, H, hd), jnp.float32, -scale, scale)
    wv = jax.random.uniform(ks[3], (nh, H, hd), jnp.float32, -scale, scale)
    bq = jax.random.uniform(ks[4], (nh, 1, hd), jnp.float32, -scale, scale)
    bk = jax.random.uniform(ks[5], (nh, 1, hd), jnp.float32, -scale, scale)
    bv = jax.random.uniform(ks[6], (nh, 1, hd), jnp.float32, -scale, scale)

    # attention mask: (B, T), mask out the last 2 positions of batch 1
    attention_mask = jnp.ones((B, T), dtype=jnp.float32)
    attention_mask = attention_mask.at[1, -2:].set(0.0)

    out = multihead_attention(hidden_states, wq, wk, wv, bq, bk, bv, attention_mask)
    out = jax.block_until_ready(out)

    ref = _reference(hidden_states, wq, wk, wv, bq, bk, bv, attention_mask)
    assert out.shape == (B, T, nh * hd), out.shape
    max_err = float(jnp.abs(out - ref).max())
    assert jnp.allclose(out, ref, atol=1e-4, rtol=1e-4), max_err

    print("KERNEL_OK")
</pallas_src>

<mosaic_0001>
module attributes {stable_mosaic.version = 11 : i64} {
  func.func @_mha_kernel(%arg0: i32, %arg1: memref<1x8x32xf32, #tpu.memory_space<vmem>>, %arg2: memref<32x384xf32, #tpu.memory_space<vmem>>, %arg3: memref<1x384xf32, #tpu.memory_space<vmem>>, %arg4: memref<1x1x8xf32, #tpu.memory_space<vmem>>, %arg5: memref<1x8x128xf32, #tpu.memory_space<vmem>>) attributes {dimension_semantics = [#tpu.dimension_semantics<parallel>], iteration_bounds = array<i64: 2>, scalar_prefetch = 0 : i64, scratch_operands = 0 : i64, tpu.core_type = #tpu.core_type<tc>, window_params = [{transform_indices = @transform_0, window_bounds = array<i64: 1, 8, 32>}, {pipeline_mode = #tpu.pipeline_mode<synchronous>, transform_indices = @transform_1, window_bounds = array<i64: 32, 384>}, {pipeline_mode = #tpu.pipeline_mode<synchronous>, transform_indices = @transform_2, window_bounds = array<i64: 1, 384>}, {transform_indices = @transform_3, window_bounds = array<i64: 1, 1, 8>}, {transform_indices = @transform_4, window_bounds = array<i64: 1, 8, 128>}]} {
    %c0 = arith.constant 0 : index
    %c0_0 = arith.constant 0 : index
    %c0_1 = arith.constant 0 : index
    %0 = vector.load %arg1[%c0, %c0_0, %c0_1] : memref<1x8x32xf32, #tpu.memory_space<vmem>>, vector<1x8x32xf32>
    %1 = vector.shape_cast %0 : vector<1x8x32xf32> to vector<8x32xf32>
    %c0_2 = arith.constant 0 : index
    %c0_3 = arith.constant 0 : index
    %2 = vector.load %arg2[%c0_2, %c0_3] : memref<32x384xf32, #tpu.memory_space<vmem>>, vector<32x384xf32>
    %cst = arith.constant dense<0.000000e+00> : vector<8x384xf32>
    %3 = tpu.matmul %1, %2, %cst {dimension_numbers = #tpu.dot_dimension_numbers<[1], [0], [0], [1], [0, 0, 1, 1], [], []>} : vector<8x32xf32>, vector<32x384xf32>, vector<8x384xf32> -> vector<8x384xf32>
    %c0_4 = arith.constant 0 : index
    %c0_5 = arith.constant 0 : index
    %4 = vector.load %arg3[%c0_4, %c0_5] : memref<1x384xf32, #tpu.memory_space<vmem>>, vector<1x384xf32>
    %5 = vector.broadcast %4 : vector<1x384xf32> to vector<8x384xf32>
    %6 = arith.addf %3, %5 : vector<8x384xf32>
    %7 = vector.extract_strided_slice %6 {offsets = [0, 0], sizes = [8, 128], strides = [1, 1]} : vector<8x384xf32> to vector<8x128xf32>
    %8 = vector.extract_strided_slice %6 {offsets = [0, 128], sizes = [8, 128], strides = [1, 1]} : vector<8x384xf32> to vector<8x128xf32>
    %9 = vector.extract_strided_slice %6 {offsets = [0, 256], sizes = [8, 128], strides = [1, 1]} : vector<8x384xf32> to vector<8x128xf32>
    %c0_6 = arith.constant 0 : index
    %c0_7 = arith.constant 0 : index
    %c0_8 = arith.constant 0 : index
    %10 = vector.load %arg4[%c0_6, %c0_7, %c0_8] : memref<1x1x8xf32, #tpu.memory_space<vmem>>, vector<1x1x8xf32>
    %11 = vector.shape_cast %10 : vector<1x1x8xf32> to vector<1x8xf32>
    %12 = vector.extract_strided_slice %7 {offsets = [0, 0], sizes = [8, 32], strides = [1, 1]} : vector<8x128xf32> to vector<8x32xf32>
    %13 = vector.extract_strided_slice %8 {offsets = [0, 0], sizes = [8, 32], strides = [1, 1]} : vector<8x128xf32> to vector<8x32xf32>
    %14 = vector.extract_strided_slice %9 {offsets = [0, 0], sizes = [8, 32], strides = [1, 1]} : vector<8x128xf32> to vector<8x32xf32>
    %cst_9 = arith.constant dense<0.000000e+00> : vector<8x8xf32>
    %15 = tpu.matmul %12, %13, %cst_9 {dimension_numbers = #tpu.dot_dimension_numbers<[1], [1], [0], [0], [0, 0, 1, 0], [], []>} : vector<8x32xf32>, vector<8x32xf32>, vector<8x8xf32> -> vector<8x8xf32>
    %cst_10 = arith.constant 0.176776692 : f32
    %16 = vector.broadcast %cst_10 : f32 to vector<8x8xf32>
    %17 = arith.mulf %15, %16 : vector<8x8xf32>
    %18 = vector.broadcast %11 : vector<1x8xf32> to vector<8x8xf32>
    %19 = arith.addf %17, %18 : vector<8x8xf32>
    %cst_11 = arith.constant dense<0xFF800000> : vector<8xf32>
    %20 = vector.multi_reduction <maximumf>, %19, %cst_11 [1] : vector<8x8xf32> to vector<8xf32>
    %21 = vector.shape_cast %20 : vector<8xf32> to vector<8x1xf32>
    %22 = vector.broadcast %21 : vector<8x1xf32> to vector<8x8xf32>
    %23 = arith.subf %19, %22 : vector<8x8xf32>
    %24 = math.exp %23 : vector<8x8xf32>
    %cst_12 = arith.constant dense<0.000000e+00> : vector<8xf32>
    %25 = vector.multi_reduction <add>, %24, %cst_12 [1] : vector<8x8xf32> to vector<8xf32>
    %26 = vector.shape_cast %25 : vector<8xf32> to vector<8x1xf32>
    %27 = vector.broadcast %26 : vector<8x1xf32> to vector<8x8xf32>
    %28 = arith.divf %24, %27 : vector<8x8xf32>
    %cst_13 = arith.constant dense<0.000000e+00> : vector<8x32xf32>
    %29 = tpu.matmul %28, %14, %cst_13 {dimension_numbers = #tpu.dot_dimension_numbers<[1], [0], [0], [1], [0, 0, 1, 1], [], []>} : vector<8x8xf32>, vector<8x32xf32>, vector<8x32xf32> -> vector<8x32xf32>
    %30 = vector.extract_strided_slice %7 {offsets = [0, 32], sizes = [8, 32], strides = [1, 1]} : vector<8x128xf32> to vector<8x32xf32>
    %31 = vector.extract_strided_slice %8 {offsets = [0, 32], sizes = [8, 32], strides = [1, 1]} : vector<8x128xf32> to vector<8x32xf32>
    %32 = vector.extract_strided_slice %9 {offsets = [0, 32], sizes = [8, 32], strides = [1, 1]} : vector<8x128xf32> to vector<8x32xf32>
    %cst_14 = arith.constant dense<0.000000e+00> : vector<8x8xf32>
    %33 = tpu.matmul %30, %31, %cst_14 {dimension_numbers = #tpu.dot_dimension_numbers<[1], [1], [0], [0], [0, 0, 1, 0], [], []>} : vector<8x32xf32>, vector<8x32xf32>, vector<8x8xf32> -> vector<8x8xf32>
    %cst_15 = arith.constant 0.176776692 : f32
    %34 = vector.broadcast %cst_15 : f32 to vector<8x8xf32>
    %35 = arith.mulf %33, %34 : vector<8x8xf32>
    %36 = vector.broadcast %11 : vector<1x8xf32> to vector<8x8xf32>
    %37 = arith.addf %35, %36 : vector<8x8xf32>
    %cst_16 = arith.constant dense<0xFF800000> : vector<8xf32>
    %38 = vector.multi_reduction <maximumf>, %37, %cst_16 [1] : vector<8x8xf32> to vector<8xf32>
    %39 = vector.shape_cast %38 : vector<8xf32> to vector<8x1xf32>
    %40 = vector.broadcast %39 : vector<8x1xf32> to vector<8x8xf32>
    %41 = arith.subf %37, %40 : vector<8x8xf32>
    %42 = math.exp %41 : vector<8x8xf32>
    %cst_17 = arith.constant dense<0.000000e+00> : vector<8xf32>
    %43 = vector.multi_reduction <add>, %42, %cst_17 [1] : vector<8x8xf32> to vector<8xf32>
    %44 = vector.shape_cast %43 : vector<8xf32> to vector<8x1xf32>
    %45 = vector.broadcast %44 : vector<8x1xf32> to vector<8x8xf32>
    %46 = arith.divf %42, %45 : vector<8x8xf32>
    %cst_18 = arith.constant dense<0.000000e+00> : vector<8x32xf32>
    %47 = tpu.matmul %46, %32, %cst_18 {dimension_numbers = #tpu.dot_dimension_numbers<[1], [0], [0], [1], [0, 0, 1, 1], [], []>} : vector<8x8xf32>, vector<8x32xf32>, vector<8x32xf32> -> vector<8x32xf32>
    %48 = vector.extract_strided_slice %7 {offsets = [0, 64], sizes = [8, 32], strides = [1, 1]} : vector<8x128xf32> to vector<8x32xf32>
    %49 = vector.extract_strided_slice %8 {offsets = [0, 64], sizes = [8, 32], strides = [1, 1]} : vector<8x128xf32> to vector<8x32xf32>
    %50 = vector.extract_strided_slice %9 {offsets = [0, 64], sizes = [8, 32], strides = [1, 1]} : vector<8x128xf32> to vector<8x32xf32>
    %cst_19 = arith.constant dense<0.000000e+00> : vector<8x8xf32>
    %51 = tpu.matmul %48, %49, %cst_19 {dimension_numbers = #tpu.dot_dimension_numbers<[1], [1], [0], [0], [0, 0, 1, 0], [], []>} : vector<8x32xf32>, vector<8x32xf32>, vector<8x8xf32> -> vector<8x8xf32>
    %cst_20 = arith.constant 0.176776692 : f32
    %52 = vector.broadcast %cst_20 : f32 to vector<8x8xf32>
    %53 = arith.mulf %51, %52 : vector<8x8xf32>
    %54 = vector.broadcast %11 : vector<1x8xf32> to vector<8x8xf32>
    %55 = arith.addf %53, %54 : vector<8x8xf32>
    %cst_21 = arith.constant dense<0xFF800000> : vector<8xf32>
    %56 = vector.multi_reduction <maximumf>, %55, %cst_21 [1] : vector<8x8xf32> to vector<8xf32>
    %57 = vector.shape_cast %56 : vector<8xf32> to vector<8x1xf32>
    %58 = vector.broadcast %57 : vector<8x1xf32> to vector<8x8xf32>
    %59 = arith.subf %55, %58 : vector<8x8xf32>
    %60 = math.exp %59 : vector<8x8xf32>
    %cst_22 = arith.constant dense<0.000000e+00> : vector<8xf32>
    %61 = vector.multi_reduction <add>, %60, %cst_22 [1] : vector<8x8xf32> to vector<8xf32>
    %62 = vector.shape_cast %61 : vector<8xf32> to vector<8x1xf32>
    %63 = vector.broadcast %62 : vector<8x1xf32> to vector<8x8xf32>
    %64 = arith.divf %60, %63 : vector<8x8xf32>
    %cst_23 = arith.constant dense<0.000000e+00> : vector<8x32xf32>
    %65 = tpu.matmul %64, %50, %cst_23 {dimension_numbers = #tpu.dot_dimension_numbers<[1], [0], [0], [1], [0, 0, 1, 1], [], []>} : vector<8x8xf32>, vector<8x32xf32>, vector<8x32xf32> -> vector<8x32xf32>
    %66 = vector.extract_strided_slice %7 {offsets = [0, 96], sizes = [8, 32], strides = [1, 1]} : vector<8x128xf32> to vector<8x32xf32>
    %67 = vector.extract_strided_slice %8 {offsets = [0, 96], sizes = [8, 32], strides = [1, 1]} : vector<8x128xf32> to vector<8x32xf32>
    %68 = vector.extract_strided_slice %9 {offsets = [0, 96], sizes = [8, 32], strides = [1, 1]} : vector<8x128xf32> to vector<8x32xf32>
    %cst_24 = arith.constant dense<0.000000e+00> : vector<8x8xf32>
    %69 = tpu.matmul %66, %67, %cst_24 {dimension_numbers = #tpu.dot_dimension_numbers<[1], [1], [0], [0], [0, 0, 1, 0], [], []>} : vector<8x32xf32>, vector<8x32xf32>, vector<8x8xf32> -> vector<8x8xf32>
    %cst_25 = arith.constant 0.176776692 : f32
    %70 = vector.broadcast %cst_25 : f32 to vector<8x8xf32>
    %71 = arith.mulf %69, %70 : vector<8x8xf32>
    %72 = vector.broadcast %11 : vector<1x8xf32> to vector<8x8xf32>
    %73 = arith.addf %71, %72 : vector<8x8xf32>
    %cst_26 = arith.constant dense<0xFF800000> : vector<8xf32>
    %74 = vector.multi_reduction <maximumf>, %73, %cst_26 [1] : vector<8x8xf32> to vector<8xf32>
    %75 = vector.shape_cast %74 : vector<8xf32> to vector<8x1xf32>
    %76 = vector.broadcast %75 : vector<8x1xf32> to vector<8x8xf32>
    %77 = arith.subf %73, %76 : vector<8x8xf32>
    %78 = math.exp %77 : vector<8x8xf32>
    %cst_27 = arith.constant dense<0.000000e+00> : vector<8xf32>
    %79 = vector.multi_reduction <add>, %78, %cst_27 [1] : vector<8x8xf32> to vector<8xf32>
    %80 = vector.shape_cast %79 : vector<8xf32> to vector<8x1xf32>
    %81 = vector.broadcast %80 : vector<8x1xf32> to vector<8x8xf32>
    %82 = arith.divf %78, %81 : vector<8x8xf32>
    %cst_28 = arith.constant dense<0.000000e+00> : vector<8x32xf32>
    %83 = tpu.matmul %82, %68, %cst_28 {dimension_numbers = #tpu.dot_dimension_numbers<[1], [0], [0], [1], [0, 0, 1, 1], [], []>} : vector<8x8xf32>, vector<8x32xf32>, vector<8x32xf32> -> vector<8x32xf32>
    %84 = tpu.concatenate %29, %47, %65, %83 in 1 : vector<8x32xf32>, vector<8x32xf32>, vector<8x32xf32>, vector<8x32xf32> -> vector<8x128xf32>
    %c0_29 = arith.constant 0 : index
    %c0_30 = arith.constant 0 : index
    %c0_31 = arith.constant 0 : index
    %85 = vector.load %arg5[%c0_29, %c0_30, %c0_31] : memref<1x8x128xf32, #tpu.memory_space<vmem>>, vector<1x8x128xf32>
    %86 = vector.shape_cast %85 : vector<1x8x128xf32> to vector<8x128xf32>
    %87 = vector.shape_cast %84 : vector<8x128xf32> to vector<1x8x128xf32>
    tpu.vector_store %arg5[%c0_29, %c0_30, %c0_31], %87 {strides = array<i32>} : memref<1x8x128xf32, #tpu.memory_space<vmem>>, vector<1x8x128xf32>,
    return
  }
  func.func @transform_0(%arg0: i32) -> (i32, i32, i32) {
    %c0_i32 = arith.constant 0 : i32
    %c0_i32_0 = arith.constant 0 : i32
    %c0_i32_1 = arith.constant 0 : i32
    return %arg0, %c0_i32, %c0_i32_0 : i32, i32, i32
  }
  func.func @transform_1(%arg0: i32) -> (i32, i32) {
    %c0_i32 = arith.constant 0 : i32
    %c0_i32_0 = arith.constant 0 : i32
    %c0_i32_1 = arith.constant 0 : i32
    return %c0_i32, %c0_i32_0 : i32, i32
  }
  func.func @transform_2(%arg0: i32) -> (i32, i32) {
    %c0_i32 = arith.constant 0 : i32
    %c0_i32_0 = arith.constant 0 : i32
    %c0_i32_1 = arith.constant 0 : i32
    return %c0_i32, %c0_i32_0 : i32, i32
  }
  func.func @transform_3(%arg0: i32) -> (i32, i32, i32) {
    %c0_i32 = arith.constant 0 : i32
    %c0_i32_0 = arith.constant 0 : i32
    %c0_i32_1 = arith.constant 0 : i32
    return %arg0, %c0_i32, %c0_i32_0 : i32, i32, i32
  }
  func.func @transform_4(%arg0: i32) -> (i32, i32, i32) {
    %c0_i32 = arith.constant 0 : i32
    %c0_i32_0 = arith.constant 0 : i32
    %c0_i32_1 = arith.constant 0 : i32
    return %arg0, %c0_i32, %c0_i32_0 : i32, i32, i32
  }
}

</mosaic_0001>

<bundles_post_ra>
// kernel: tpu_custom_call.1
= control target key start
LH: loop header
LB: loop body
LE: loop exit
PB: predicated region body
PF: predicated region fallthrough
CT: control target
= control target key end

     0   :  { %9 = vsyncpa [#allocation3], 0  ;;  %s1847_s0 = inlined_call_operand.hbm [shape: f32[2,8,32], index: 0, kind: input, shape index: {}]   ;;  %s1848_s1 = inlined_call_operand.hbm [shape: f32[32,384], index: 1, kind: input, shape index: {}]   ;;  %s1849_s2 = inlined_call_operand.vmem [shape: f32[1,384], index: 2, kind: input, shape index: {}]   ;;  %s1850_s3 = inlined_call_operand.vmem [shape: f32[2,1,8], index: 3, kind: input, shape index: {}]   ;;  %s1851_s4 = inlined_call_operand.hbm [shape: f32[2,8,128], index: 4, kind: output, shape index: {}]  }
   0x1   :  { %11 = vsyncpa [#allocation3 + $0x1], 0 }
   0x2   :  { %12 = vsyncpa [#allocation6], 0 }
   0x3   :  { %13 = vsyncpa [#allocation4], 0 }
   0x4   :  { %15 = vsyncpa [#allocation4 + $0x1], 0  ;;  %s1572_s15 = smov 0   ;;  %s1574_s16 = smov 0  }
   0x5   :  { %s1576_s17 = smov 0   ;;  %s1578_s18 = smov 0  }
   0x6 LB: > { %s1593_s19 = sadd.s32 4294967295, %s1534_s18   ;;  %s1210_s20 = sadd.s32 4294967294, %s1534_s18   ;;  %s1534_s18 = sphi %s1578_s18, %s1871_s18   ;;  %s1530_s17 = sphi %s1576_s17, %s1870_s17   ;;  %s1526_s16 = sphi %s1574_s16, %s1869_s16   ;;  %s1522_s15 = sphi %s1572_s15, %s1868_s15  }
   0x7   : > { %p41_p0 = scmp.ne.s32.totalorder %s1526_s16, %s1522_s15  ;;  %p1852_p1 = scmp.eq.s32.totalorder %s1593_s19, 0 }
   0x8   : > { %p139_p3 = scmp.eq.s32.totalorder %s1210_s20, 1  ;;  %p1211_p5 = scmp.ge.s32.totalorder %s1534_s18, 1 }
   0x9   : > { %p1602_p4 = por %p1852_p1, %p41_p0  ;;  %p146_p7 = scmp.lt.s32.totalorder %s1534_s18, 3 }
   0xa   : > { %p1607_p6 = por %p139_p3, %p41_p0  ;;  %s1536_s24 = smov [#allocation5]  }
   0xb   : > { %s1855_s21 = scalar_select %p1602_p4, 1, 0 }
   0xc   : > { %s1856_s22 = scalar_select %p1607_p6, 1, 0 }
   0xd   : > { %p1612_p8 = pnand %p1211_p5, %p146_p7  ;;  %s158_s25 = sshll.u32 %s1536_s24, 4  ;;  %s1616_s25 = int_to_ptr.vmem [resolvable:$true] %s158_s25 }
   0xe   : > { %s1628_s27 = sadd.s32 1, %s1534_s18   ;;  %s28_s28 = sadd.s32 1, %s1530_s17 }
   0xf   : > { %s1857_s23 = scalar_select %p1612_p8, 1, 0 }
  0x10   : > { %p1333_p9 = pneg %p1612_p8  ;;  %s25_s29 = ssub.s32 %s1534_s18, %s1628_s27 }
  0x11   : > { %s1406_s6 = scalar_lea.hbm %s1848_s1, 1536 }
  0x12   : > { %p1623_p11 = pnand %p1333_p9, %p1852_p1  ;;  %p1407_p12 = scmp.ne.s32.totalorder %s1848_s1, %s1406_s6 }
  0x13   : > { %p1413_p5 = scmp.lt.u32.totalorder %s1406_s6, %s1848_s1 }
  0x14   : > { %p1408_p13 = pneg %p1623_p11 }
  0x16   : > { %p1409_p0 = pnand %p1408_p13, %p1407_p12 }
  0x18   : > { %p1410_p3 = pneg %p1409_p0 }
  0x1a   : > { %p1415_p7 = pnand %p1413_p5, %p1410_p3 }
  0x1c   : > { %1418 = shalt.err (!%p1415_p7)
}
  0x1d   : > { %s1419_s11 = scalar_lea.vmem %s1616_s25, 1536  ;;  %p1427_p2 = scmp.lt.s32.totalorder %s1616_s25, %s1616_s25 }
  0x1e   : > { %p1420_p9 = scmp.ne.s32.totalorder %s1616_s25, %s1419_s11  ;;  %p1428_p6 = scmp.lt.s32.totalorder %s1419_s11, %s1419_s11 }
  0x20   : > { %p1422_p10 = pnand %p1420_p9, %p1408_p13  ;;  %p1429_p4 = por %p1428_p6, %p1427_p2 }
  0x22   : > { %p1423_p1 = pneg %p1422_p10 }
  0x24   : > { %p1430_p8 = pnand %p1429_p4, %p1423_p1 }
  0x26   : > { %1433 = shalt.err (!%p1430_p8)
}
  0x27   : > { %s1537_s12 = smov 384   ;;  %s1538_s13 = smov 24  }
  0x28   : > { %1336 = dma.hbm_to_vmem [thread:$0]  (!%p1623_p11), %s1848_s1, 1536, %s1616_s25, [#allocation6], %s1537_s12, %s1537_s12, %s1538_s13  }
  0x29   : > { %p26_p2 = scmp.eq.s32.totalorder %s25_s29, 0  ;;  %p35_p1 = scmp.ne.s32.totalorder %s1530_s17, %s1526_s16 }
  0x2a   : > { %p36_p4 = scmp.eq.s32.totalorder %s1534_s18, 0  ;;  %p1346_p6 = scmp.lt.s32.totalorder %s1534_s18, 2 }
  0x2b   : > { %s1659_s24 = scalar_select %p26_p2, %s1530_s17, %s28_s28  }
  0x2c   : > { %p37_p8 = por %p36_p4, %p35_p1  ;;  %p1859_p10 = scmp.eq.s32.totalorder %s1593_s19, 1 }
  0x2d   : > { %s175_s5 = sand.u32 1, %s1530_s17   ;;  %s1215_s6 = sshll.u32 %s1534_s18, 7 }
  0x2e   : > { %p1663_p12 = por %p1859_p10, %p35_p1  ;;  %s1214_s7 = sshll.u32 %s175_s5, 3 }
  0x2f   : > { %s1672_s9 = scalar_lea.hbm %s1847_s0, %s1215_s6  ;;  %s179_s25 = scalar_lea.vmem [#allocation2], %s1214_s7 }
  0x30   : > { %s186_s28 = sshll.u32 %s179_s25, 4  ;;  %p1674_p11 = pnand %p1346_p6, %p37_p8  ;;  %s1678_s28 = int_to_ptr.vmem [resolvable:$true] %s186_s28 }
  0x31   : > { %s176_s10 = scalar_lea.sflag [#allocation3], %s175_s5  ;;  %s1434_s11 = scalar_lea.hbm %s1672_s9, 128 }
  0x32   : > { %p1435_p13 = scmp.ne.s32.totalorder %s1672_s9, %s1434_s11  ;;  %p1436_p0 = pneg %p1674_p11 }
  0x33   : > { %s1439_s14 = scalar_lea.hbm %s1847_s0, 256  ;;  %p1440_p7 = scmp.lt.u32.totalorder %s1672_s9, %s1847_s0 }
  0x34   : > { %p1437_p3 = pnand %p1436_p0, %p1435_p13  ;;  %p1441_p9 = scmp.lt.u32.totalorder %s1439_s14, %s1434_s11 }
  0x35   : > { %p1443_p1 = scmp.lt.u32.totalorder %s1434_s11, %s1672_s9 }
  0x36   : > { %p1438_p5 = pneg %p1437_p3  ;;  %p1442_p2 = por %p1441_p9, %p1440_p7 }
  0x38   : > { %p1444_p4 = por %p1443_p1, %p1442_p2 }
  0x3a   : > { %p1445_p6 = pnand %p1444_p4, %p1438_p5 }
  0x3c   : > { %1448 = shalt.err (!%p1445_p6)
}
  0x3d   : > { %s1449_s5 = scalar_lea.vmem %s1678_s28, 128  ;;  %s1539_s7 = smov [#allocation2]  }
  0x3e   : > { %p1450_p8 = scmp.ne.s32.totalorder %s1678_s28, %s1449_s5  ;;  %s1454_s26 = sshll.u32 %s1539_s7, 4  ;;  %s1455_s26 = int_to_ptr.vmem [resolvable:$false] %s1454_s26 }
  0x3f   : > { %s1456_s8 = scalar_lea.vmem %s1455_s26, 256  ;;  %p1457_p3 = scmp.lt.s32.totalorder %s1678_s28, %s1455_s26 }
  0x40   : > { %p1452_p10 = pnand %p1450_p8, %p1436_p0  ;;  %p1458_p7 = scmp.lt.s32.totalorder %s1456_s8, %s1449_s5 }
  0x42   : > { %p1453_p13 = pneg %p1452_p10  ;;  %p1459_p9 = por %p1458_p7, %p1457_p3 }
  0x44   : > { %p1460_p2 = pnand %p1459_p9, %p1453_p13 }
  0x46   : > { %1463 = shalt.err (!%p1460_p2)
}
  0x47   : > { %1340 = dma.hbm_to_vmem [thread:$0]  (!%p1674_p11), %s1672_s9, 128, %s1678_s28, %s176_s10  }
  0x48   : > { %p1862_p5 = scmp.ne.s32.totalorder %s1857_s23, 0 }
  0x49   : > { %s1708_s25 = sand.u32 (!%p1862_p5), 1, %s1526_s16   ;;  %p1863_p0 = scmp.ne.s32.totalorder (!%p1862_p5), %s1855_s21, 0 }
  0x4a   : > { %201 = sbr.rel (%p1862_p5) target bundleno = 1311 (0x51f), region = 36  ;;  %s1217_s11 = sshll.u32 (!%p1862_p5), %s1708_s25, 3 }
  0x4b   : > { %s204_s12 = scalar_lea.sflag (!%p1862_p5), [#allocation3], %s1708_s25  ;;  %s207_s13 = scalar_lea.vmem (!%p1862_p5), [#allocation2], %s1217_s11 }
  0x51   : > { %1509 = dma.done.wait (%p1863_p0), %s204_s12, 128  }
  0x52   : > { %1511 = vsyncadd (%p1863_p0), %s204_s12, 4294967168  ;;  %p1864_p11 = scmp.eq.s32.totalorder %s1593_s19, 0 }
  0x54   : > { %1513 = dma.done.wait (%p1864_p11), [#allocation6], 1536   ;;  %p1865_p1 = pmov %p1864_p11 }
  0x55   : > { %v1540_v0 = vmov 0.0   ;;  %v244_v1 = vld [vmem:[#allocation5 + $0x8] sm:$0xff]  ;;  %v247_v2 = vld [vmem:[#allocation5 + $0x20] sm:$0xff]  ;;  %v246_v5 = vld [vmem:[#allocation5 + $0x18] sm:$0xff]  ;;  %vm272_vm0 = vcmask 261120   ;;  %vm1541_vm1 = vmmov 0   ;;  %v257_v14 = vlaneseq }
  0x56   : > { %1515 = vsyncadd (%p1865_p1), [#allocation6], 4294965760  ;;  %340 = vmatprep.mubr.f32.mxu0 %v1540_v0  ;;  %v243_v3 = vld [vmem:[#allocation5] sm:$0xff]  ;;  %v1311_v4 = vpack.c.bf16 %v247_v2, %v244_v1  ;;  %v250_v6 = vld [vmem:[#allocation5 + $0x38] sm:$0xff]  ;;  %1268 = vmatprep.mubr.msk.f32.mxu1 %vm1541_vm1, %v1540_v0  ;;  %s1542_s9 = smov 64   ;;  %s1543_s28 = smov 96  }
  0x57   : > { %v253_v7 = vld [vmem:[#allocation5 + $0x50] sm:$0xff]  ;;  %v1313_v8 = vpack.c.bf16 %v246_v5, %v243_v3  ;;  %v252_v11 = vld [vmem:[#allocation5 + $0x48] sm:$0xff]  ;;  %v1729_v15 = vshrl.u32 %v257_v14, 7  ;;  %v251_v26 = vld [vmem:[#allocation5 + $0x40] sm:$0xff]  ;;  %v1544_v27 = vmov 0.0|0.0   ;;  %s1545_s29 = smov 32  }
  0x58   : > { %v1315_v9 = vpack.c.bf16 %v253_v7, %v250_v6  ;;  %v249_v10 = vld [vmem:[#allocation5 + $0x30] sm:$0xff]  ;;  %1312 = vmatprep.subr.bf16.mxu0 %v1311_v4  ;;  %v248_v25 = vld [vmem:[#allocation5 + $0x28] sm:$0xff]  ;;  %1319 = vmatprep.subr.bf16.mxu1 %v1544_v27  ;;  %v254_v29 = vld [vmem:[#allocation5 + $0x58] sm:$0xff]  ;;  %p239_p4 = scmp.lt.s32.totalorder %s1593_s19, 1  ;;  %vm502_vm2 = vcmask 64512   ;;  %vm1102_vm3 = vcmask 523264  }
  0x59   : > { %1314 = vmatpush1.bf16.msra.mxu0 %v1313_v8  ;;  %v1317_v12 = vpack.c.bf16 %v252_v11, %v249_v10  ;;  %v242_v13 = vld [vmem:[%s207_s13] sm:$0xff]  ;;  %v263_v16 = vsub.s32 1, %v1729_v15  ;;  %v259_v18 = vsub.s32 0, %v1729_v15  ;;  %v1323_v31 = vpack.c.bf16 %v254_v29, %v251_v26  ;;  %s1236_s5 = sshll.u32 %s1593_s19, 7  ;;  %s238_s7 = scalar_lea.vmem [#allocation7], %s1217_s11 }
  0x5a   : > { %1316 = vmatprep.subr.bf16.mxu0 %v1315_v9  ;;  %v255_v17 = vld [vmem:[%s1849_s2] sm:$0x7]  ;;  %s240_s10 = scalar_select %p239_p4, %s1593_s19, 1  ;;  %v267_v42 = vsub.s32 2, %v1729_v15  ;;  %vm1104_vm4 = vcmask 785408  }
  0x5b   : > { %v264_v19 = vrot.slane %v255_v17, %v263_v16  ;;  %v260_v22 = vrot.slane %v255_v17, %v259_v18  ;;  %v245_v24 = vld [vmem:[#allocation5 + $0x10] sm:$0xff]  ;;  %s1121_s26 = sshll.u32 %s238_s7, 4  ;;  %s1803_s13 = scalar_lea.hbm %s1851_s4, %s1236_s5  ;;  %s1805_s26 = int_to_ptr.vmem [resolvable:$true] %s1121_s26 }
  0x5c   : > { %v1320_v28 = vpack.c.bf16 %v248_v25, %v245_v24  ;;  %s241_s6 = scalar_lea.vmem %s1850_s3, %s240_s10  ;;  %v268_v44 = vrot.slane %v255_v17, %v267_v42  ;;  %s1108_s19 = scalar_lea.sflag [#allocation4], %s1708_s25 }
  0x5d   : > { %1318 = vmatpush1.bf16.msra.mxu0 %v1317_v12  ;;  %v1224_v39 = vld [vmem:[%s241_s6] ss:$0 sm:$0xff]  ;;  %s1464_s11 = scalar_lea.vmem %s1805_s26, 128  ;;  %s1546_s21 = smov [#allocation7]  }
  0x5e   : > { %1271 = vmatprep.subr.mxu0 %v1540_v0  ;;  %1321 = vmatpush3.bf16.msra.mxu1 %v1320_v28  ;;  %p1465_p6 = scmp.ne.s32.totalorder %s1805_s26, %s1464_s11  ;;  %s1468_s23 = sshll.u32 %s1546_s21, 4  ;;  %s1469_s23 = int_to_ptr.vmem [resolvable:$false] %s1468_s23 }
  0x5f   : > { %1322 = vmatprep.subr.bf16.mxu1 %v1544_v27  ;;  %p1471_p13 = scmp.lt.s32.totalorder %s1805_s26, %s1469_s23 }
  0x60   : > { %1220 = vmatmul.mubr.msk.f32.vlgmr.msra.gmra.mrb[0].mxu0 %vm272_vm0, %v242_v13  ;;  %p1466_p8 = pnand %p1465_p6, %p1663_p12 }
  0x61   : > { %1273 = vmatprep.mubr.msk.f32.mxu0 %vm1541_vm1, %v1540_v0 }
  0x62   : > { %1324 = vmatpush3.bf16.msra.mxu1 %v1323_v31  ;;  %p1467_p10 = pneg %p1466_p8 }
  0x63   : > { %1276 = vmatprep.subr.mxu1 %v1540_v0 }
  0x65   : > { %1269 = vmatmul.mubr.msk.f32.vlgmr.msra.gmra.mrb[0].mxu1 %vm272_vm0, %v242_v13 }
  0x66   : > { %1278 = vmatprep.mubr.msk.f32.mxu1 %vm1541_vm1, %v1540_v0 }
 0x133   : > { %v342_v20 = vpop.f32.mrb[0].mxu0 }
 0x134   : > { %v344_v21 = vpop.f32.mrb[1].mxu0  ;;  %v343_v30 = vadd.f32 %v342_v20, %v260_v22 }
 0x135   : > { %v345_v23 = vadd.f32 %v344_v21, %v264_v19 }
 0x137   : > { %757 = vrot.lane.b32.xlu1 %v345_v23, %s1542_s9  ;;  %589 = vrot.lane.b32.xlu0 %v345_v23, %s1543_s28 }
 0x138   : > { %1272 = vmatpush3.xpose.msk.msra.mxu0 %vm272_vm0, %v345_v23  ;;  %v413_v46 = vpop.f32.mrb[0].mxu1 }
 0x139   : > { %1281 = vmatprep.subr.mxu0 %v1540_v0  ;;  %v414_v47 = vadd.f32 %v413_v46, %v268_v44  ;;  %v1270_v48 = vpop.f32.mrb[1].mxu1 }
 0x13b   : > { %1274 = vmatmul.mubr.msk.f32.vlgmr.msra.gmra.mrb[2].mxu0 %vm272_vm0, %v343_v30  ;;  %755 = vrot.lane.b32.xlu1 %v343_v30, %s1542_s9 }
 0x13c   : > { %587 = vrot.lane.b32.xlu0 %v343_v30, %s1543_s28  ;;  %1283 = vmatprep.mubr.msk.f32.mxu0 %vm1541_vm1, %v1540_v0 }
 0x13d   : > { %1277 = vmatpush3.msra.mxu1 %v414_v47 }
 0x13e   : > { %1286 = vmatprep.subr.mxu1 %v1540_v0 }
 0x13f   : > { %922 = vrot.lane.b32.xlu1 %v343_v30, %s1545_s29 }
 0x140   : > { %924 = vrot.lane.b32.xlu0 %v345_v23, %s1545_s29 }
 0x1a9   : > { %v590_v32 = vpop.permute.xlu0 %589  ;;  %v758_v33 = vpop.permute.xlu1 %757 }
 0x1aa   : > { %1282 = vmatpush3.xpose.msk.msra.mxu0 %vm272_vm0, %v590_v32 }
 0x1ab   : > { %1291 = vmatprep.subr.mxu0 %v1540_v0 }
 0x1ad   : > { %v756_v35 = vpop.permute.xlu1 %755 }
 0x1ae   : > { %v588_v34 = vpop.permute.xlu0 %587 }
 0x1af   : > { %1284 = vmatmul.mubr.msk.f32.vlgmr.msra.gmra.mrb[4].mxu0 %vm272_vm0, %v588_v34 }
 0x1b0   : > { %1292 = vmatpush3.xpose.msk.msra.mxu0 %vm272_vm0, %v758_v33  ;;  %1293 = vmatprep.mubr.msk.f32.mxu0 %vm1541_vm1, %v1540_v0 }
 0x1b1   : > { %1301 = vmatprep.subr.mxu0 %v1540_v0  ;;  %v923_v37 = vpop.permute.xlu1 %922 }
 0x1b2   : > { %v925_v36 = vpop.permute.xlu0 %924 }
 0x1b3   : > { %1294 = vmatmul.mubr.msk.f32.vlgmr.msra.gmra.mrb[6].mxu0 %vm272_vm0, %v756_v35 }
 0x1b4   : > { %1302 = vmatpush3.xpose.msk.msra.mxu0 %vm272_vm0, %v925_v36  ;;  %1303 = vmatprep.mubr.msk.f32.mxu0 %vm1541_vm1, %v1540_v0 }
 0x1b7   : > { %1304 = vmatmul.mubr.msk.f32.vlgmr.msra.gmra.mrb[8].mxu0 %vm272_vm0, %v923_v37 }
 0x20e   : > { %v490_v38 = vpop.f32.mrb[2].mxu0 }
 0x20f   : > { %v494_v40 = vmul.f32 0.17677669, %v490_v38  ;;  %v1275_v41 = vpop.f32.mrb[3].mxu0 }
 0x211   : > { %v501_v43 = vadd.f32 %v1224_v39, %v494_v40 }
 0x213   : > { %v503_v45 = vsel %vm502_vm2, %v501_v43, -inf }
 0x214   : > { %504 = vmax.xlane.f32.xlu0 %v503_v45 }
 0x282   : > { %v661_v49 = vpop.f32.mrb[4].mxu0 }
 0x283   : > { %v665_v50 = vmul.f32 0.17677669, %v661_v49  ;;  %v1285_v51 = vpop.f32.mrb[5].mxu0 }
 0x285   : > { %v666_v52 = vadd.f32 %v1224_v39, %v665_v50 }
 0x286   : > { %v829_v53 = vpop.f32.mrb[6].mxu0 }
 0x287   : > { %v833_v54 = vmul.f32 0.17677669, %v829_v53  ;;  %v1295_v55 = vpop.f32.mrb[7].mxu0  ;;  %v667_v56 = vsel %vm502_vm2, %v666_v52, -inf }
 0x288   : > { %668 = vmax.xlane.f32.xlu1 %v667_v56 }
 0x289   : > { %v834_v57 = vadd.f32 %v1224_v39, %v833_v54 }
 0x28a   : > { %v996_v58 = vpop.f32.mrb[8].mxu0 }
 0x28b   : > { %v1000_v59 = vmul.f32 0.17677669, %v996_v58  ;;  %v1305_v60 = vpop.f32.mrb[9].mxu0  ;;  %v835_v61 = vsel %vm502_vm2, %v834_v57, -inf }
 0x28c   : > { %836 = vmax.xlane.f32.xlu0 %v835_v61 }
 0x28d   : > { %v1001_v62 = vadd.f32 %v1224_v39, %v1000_v59 }
 0x28f   : > { %v1002_v63 = vsel %vm502_vm2, %v1001_v62, -inf }
 0x290   : > { %1003 = vmax.xlane.f32.xlu0 %v1002_v63 }
 0x299   : > { %679 = vrot.lane.b32.xlu1 %v414_v47, %s1543_s28 }
 0x2a1   : > { %v505_v1 = vpop.xlane.xlu0 %504 }
 0x2a2   : > { %v506_v2 = vsub.f32 %v501_v43, %v505_v1 }
 0x2a4   : > { %v507_v3 = vmul.f32 1.442695, %v506_v2 }
 0x2a6   : > { %1390 = vpow2.f32 %v507_v3 }
 0x2b0   : > { %v1391_v4 = vpop.eup %1390 }
 0x2b1   : > { %v509_v5 = vsel %vm502_vm2, %v1391_v4, 0.0 }
 0x2bd   : > { %510 = vadd.xlane.f32.xlu1 %v509_v5 }
 0x315   : > { %v669_v6 = vpop.xlane.xlu1 %668 }
 0x316   : > { %v670_v7 = vsub.f32 %v666_v52, %v669_v6 }
 0x318   : > { %v671_v8 = vmul.f32 1.442695, %v670_v7 }
 0x319   : > { %v837_v9 = vpop.xlane.xlu0 %836  ;;  %v680_v21 = vpop.permute.xlu1 %679 }
 0x31a   : > { %1392 = vpow2.f32 %v671_v8  ;;  %v838_v10 = vsub.f32 %v834_v57, %v837_v9 }
 0x31c   : > { %v839_v11 = vmul.f32 1.442695, %v838_v10 }
 0x31d   : > { %v1004_v12 = vpop.xlane.xlu0 %1003 }
 0x31e   : > { %1394 = vpow2.f32 %v839_v11  ;;  %v1005_v13 = vsub.f32 %v1001_v62, %v1004_v12 }
 0x320   : > { %v1006_v14 = vmul.f32 1.442695, %v1005_v13 }
 0x322   : > { %1396 = vpow2.f32 %v1006_v14 }
 0x324   : > { %v1393_v15 = vpop.eup %1392 }
 0x325   : > { %v673_v16 = vsel %vm502_vm2, %v1393_v15, 0.0 }
 0x326   : > { %674 = vadd.xlane.f32.xlu0 %v673_v16 }
 0x328   : > { %v1395_v17 = vpop.eup %1394 }
 0x329   : > { %v841_v18 = vsel %vm502_vm2, %v1395_v17, 0.0 }
 0x32a   : > { %842 = vadd.xlane.f32.xlu1 %v841_v18 }
 0x32c   : > { %v1397_v19 = vpop.eup %1396 }
 0x32d   : > { %v1008_v20 = vsel %vm502_vm2, %v1397_v19, 0.0 }
 0x32e   : > { %1009 = vadd.xlane.f32.xlu0 %v1008_v20 }
 0x33b   : > { %1013 = vrot.lane.b32.xlu1 %v414_v47, %s1545_s29 }
 0x344   : > { %846 = vrot.lane.b32.xlu0 %v414_v47, %s1542_s9 }
 0x34a   : > { %v511_v22 = vpop.xlane.xlu1 %510 }
 0x34b   : > { %1398 = vrcp.f32 %v511_v22 }
 0x355   : > { %v1399_v23 = vpop.eup %1398 }
 0x356   : > { %v513_v24 = vmul.f32 %v1399_v23, %v1391_v4 }
 0x358   : > { %1279 = vmatmul.mubr.msk.f32.vlgmr.msra.gmra.mrb[2].mxu1 %vm502_vm2, %v513_v24 }
 0x359   : > { %1287 = vmatpush3.msra.mxu1 %v680_v21  ;;  %1288 = vmatprep.mubr.msk.f32.mxu1 %vm1541_vm1, %v1540_v0 }
 0x35a   : > { %1296 = vmatprep.subr.mxu1 %v1540_v0 }
 0x3b3   : > { %v675_v25 = vpop.xlane.xlu0 %674 }
 0x3b4   : > { %1400 = vrcp.f32 %v675_v25 }
 0x3b7   : > { %v843_v26 = vpop.xlane.xlu1 %842 }
 0x3b8   : > { %1402 = vrcp.f32 %v843_v26 }
 0x3bb   : > { %v1010_v27 = vpop.xlane.xlu0 %1009  ;;  %v1014_v33 = vpop.permute.xlu1 %1013 }
 0x3bc   : > { %1404 = vrcp.f32 %v1010_v27 }
 0x3be   : > { %v1401_v28 = vpop.eup %1400 }
 0x3bf   : > { %v677_v29 = vmul.f32 %v1401_v28, %v1393_v15  ;;  %v847_v30 = vpop.permute.xlu0 %846 }
 0x3c1   : > { %1289 = vmatmul.mubr.msk.f32.vlgmr.msra.gmra.mrb[4].mxu1 %vm502_vm2, %v677_v29 }
 0x3c2   : > { %v1403_v31 = vpop.eup %1402  ;;  %1297 = vmatpush3.msra.mxu1 %v847_v30  ;;  %1298 = vmatprep.mubr.msk.f32.mxu1 %vm1541_vm1, %v1540_v0 }
 0x3c3   : > { %v845_v32 = vmul.f32 %v1403_v31, %v1395_v17  ;;  %1306 = vmatprep.subr.mxu1 %v1540_v0 }
 0x3c5   : > { %1299 = vmatmul.mubr.msk.f32.vlgmr.msra.gmra.mrb[6].mxu1 %vm502_vm2, %v845_v32 }
 0x3c6   : > { %v1405_v34 = vpop.eup %1404  ;;  %1307 = vmatpush3.msra.mxu1 %v1014_v33  ;;  %1308 = vmatprep.mubr.msk.f32.mxu1 %vm1541_vm1, %v1540_v0 }
 0x3c7   : > { %v1012_v35 = vmul.f32 %v1405_v34, %v1397_v19 }
 0x3c9   : > { %1309 = vmatmul.mubr.msk.f32.vlgmr.msra.gmra.mrb[8].mxu1 %vm502_vm2, %v1012_v35 }
 0x42b   : > { %v583_v36 = vpop.f32.mrb[2].mxu1 }
 0x42c   : > { %v1280_v37 = vpop.f32.mrb[3].mxu1 }
 0x494   : > { %v751_v38 = vpop.f32.mrb[4].mxu1 }
 0x495   : > { %1090 = vrot.lane.b32.xlu1 %v751_v38, %s1545_s29  ;;  %v1290_v39 = vpop.f32.mrb[5].mxu1 }
 0x498   : > { %v918_v40 = vpop.f32.mrb[6].mxu1 }
 0x499   : > { %1094 = vrot.lane.b32.xlu0 %v918_v40, %s1542_s9  ;;  %v1300_v41 = vpop.f32.mrb[7].mxu1  ;;  %s1470_s9 = scalar_lea.vmem %s1469_s23, 256 }
 0x49a   : > { %p1472_p3 = scmp.lt.s32.totalorder %s1470_s9, %s1464_s11 }
 0x49c   : > { %v1085_v42 = vpop.f32.mrb[8].mxu1  ;;  %p1473_p7 = por %p1472_p3, %p1471_p13 }
 0x49d   : > { %1098 = vrot.lane.b32.xlu1 %v1085_v42, %s1543_s28  ;;  %v1310_v0 = vpop.f32.mrb[9].mxu1 }
 0x49e   : > { %p1474_p9 = pnand %p1473_p7, %p1467_p10 }
 0x507   : > { %v1091_v43 = vpop.permute.xlu1 %1090 }
 0x508   : > { %v1101_v45 = vsel %vm272_vm0, %v583_v36, %v1091_v43 }
 0x50b   : > { %v1095_v44 = vpop.permute.xlu0 %1094 }
 0x50c   : > { %v1103_v46 = vsel %vm1102_vm3, %v1101_v45, %v1095_v44 }
 0x50f   : > { %v1099_v47 = vpop.permute.xlu1 %1098 }
 0x510   : > { %v1105_v48 = vsel %vm1104_vm4, %v1103_v46, %v1099_v47 }
 0x511   : > { %1106 = vst [vmem:[%s238_s7] sm:$0xff] %v1105_v48 }
 0x512   : > { %1477 = shalt.err (!%p1474_p9)
}
 0x513   : > { %s1478_s25 = scalar_lea.hbm %s1803_s13, 128  ;;  %s1482_s10 = scalar_lea.hbm %s1851_s4, 256 }
 0x514   : > { %p1479_p2 = scmp.ne.s32.totalorder %s1803_s13, %s1478_s25  ;;  %p1483_p11 = scmp.lt.u32.totalorder %s1803_s13, %s1851_s4 }
 0x515   : > { %p1484_p1 = scmp.lt.u32.totalorder %s1482_s10, %s1478_s25  ;;  %p1486_p6 = scmp.lt.u32.totalorder %s1478_s25, %s1803_s13 }
 0x516   : > { %p1480_p5 = pnand %p1479_p2, %p1663_p12 }
 0x517   : > { %p1485_p4 = por %p1484_p1, %p1483_p11 }
 0x518   : > { %p1481_p0 = pneg %p1480_p5 }
 0x519   : > { %p1487_p8 = por %p1486_p6, %p1485_p4 }
 0x51b   : > { %p1488_p10 = pnand %p1487_p8, %p1481_p0 }
 0x51d   : > { %1491 = shalt.err (!%p1488_p10)
}
 0x51e   : > { %1331 = dma.vmem_to_hbm [thread:$0]  (%p1663_p12), %s1805_s26, 128, %s1803_s13, %s1108_s19  }
 0x51f PF: > { %s1133_s6 = sand.u32 1, %s1522_s15   ;;  %p1866_p13 = scmp.ne.s32.totalorder %s1856_s22, 0 }
 0x520   : > { %p1867_p3 = scmp.ge.s32.totalorder %s1534_s18, 2  ;;  %s1134_s5 = scalar_lea.sflag [#allocation4], %s1133_s6 }
 0x522   : > { %p1342_p7 = pnand %p1867_p3, %p1866_p13 }
 0x524   : > { %1517 = dma.done.wait (!%p1342_p7), %s1134_s5, 128  }
 0x525   : > { %1519 = vsyncadd (!%p1342_p7), %s1134_s5, 4294967168  ;;  %p18_p9 = scmp.ge.s32.totalorder %s1628_s27, 4   ;;  %s1868_s15 = smov %s1526_s16 }
 0x526   : > { %s1869_s16 = smov %s1530_s17  ;;  %s1870_s17 = smov %s1659_s24 }
 0x527   : > { %s1871_s18 = smov %s1628_s27  ;;  %20 = sbr.rel (!%p18_p9) target bundleno = 6 (0x6), region = 88 }
 0x52e   :  { %1139 = vsyncpa [#allocation3], 1 }
 0x52f   :  { %1141 = vsyncpa [#allocation3 + $0x1], 1 }
 0x530   :  { %1142 = vsyncpa [#allocation6], 1 }
 0x531   :  { %1143 = vsyncpa [#allocation4], 1 }
 0x532   :  { %1145 = vsyncpa [#allocation4 + $0x1], 1 }

</bundles_post_ra>
